<compile_context>
chip_gen: v7x
topology: tpu7x:2x2x1
jax: 0.10.0
libtpu: 0.0.40
codegen_flags: <defaults>
</compile_context>

<pallas_src>
import functools

import jax
import jax.numpy as jnp
from jax.experimental import pallas as pl
from jax.experimental.pallas import tpu as pltpu


# ----------------------------- kernels --------------------------------------


def _cmix_resident_kernel(k_ref, wk_ref, wv_ref, o_ref):
    # Full Wk/Wv resident in VMEM (constant block index -> fetched once).
    h = jnp.dot(k_ref[...], wk_ref[...], preferred_element_type=jnp.float32)
    h = jnp.maximum(h, 0.0)
    h = h * h                                   # relu(.)**2 in f32
    o_ref[...] = jnp.dot(h.astype(jnp.bfloat16), wv_ref[...],
                         preferred_element_type=jnp.float32).astype(o_ref.dtype)


def _cmix_stream_kernel(k_ref, wk_ref, wv_ref, o_ref, acc_ref):
    # Hidden (4C) axis is the inner "arbitrary" grid axis; weight tiles stream.
    j = pl.program_id(1)

    @pl.when(j == 0)
    def _():
        acc_ref[...] = jnp.zeros_like(acc_ref)

    h = jnp.dot(k_ref[...], wk_ref[...], preferred_element_type=jnp.float32)
    h = jnp.maximum(h, 0.0)
    h = h * h
    acc_ref[...] += jnp.dot(h.astype(jnp.bfloat16), wv_ref[...],
                            preferred_element_type=jnp.float32)

    @pl.when(j == pl.num_programs(1) - 1)
    def _():
        o_ref[...] = acc_ref[...].astype(o_ref.dtype)


# --------------------------- tile selection ----------------------------------


def _round_up(n, m):
    return (n + m - 1) // m * m


def _vmem_budget_bytes():
    """Per-core VMEM budget with ~15% headroom; conservative fallback."""
    cap = 0
    try:
        cap = int(getattr(pltpu.get_tpu_info(), "vmem_capacity_bytes", 0))
    except Exception:
        cap = 0
    if cap <= 0:
        cap = 64 * 1024 * 1024          # v7x per-core size; lower bound elsewhere
    return int(cap * 0.85)


def _resident_vmem_bytes(tm, C, H):
    # k bf16 (2 bufs) + out f32 (2 bufs) + Wk/Wv bf16 (2 bufs each, resident)
    # + (tm, H) hidden intermediate in f32 + bf16.
    return 4 * tm * C + 8 * tm * C + 8 * C * H + 6 * tm * H


def _stream_vmem_bytes(tm, th, C, H):
    # k + out (double-buffered) + f32 accumulator + Wk/Wv tiles (2 bufs each)
    # + (tm, th) hidden intermediate.
    del H
    return 4 * tm * C + 8 * tm * C + 4 * tm * C + 8 * C * th + 6 * tm * th


def _pick_tiles(M, C, H, tm_req, budget):
    """Return (resident, tm, th). tm multiple of 16, th multiple of 128."""
    m_cap = _round_up(M, 16)
    cands = []
    for t in (tm_req, 1024, 768, 512, 384, 256, 128, 64, 32, 16):
        if t is None:
            continue
        t = max(16, (int(t) // 16) * 16)    # multiple of 16 (bf16 sublane pack)
        t = min(t, m_cap)
        if t not in cands:
            cands.append(t)
    cands.sort(reverse=True)

    # Prefer resident weights: weight HBM traffic drops to a single pass.
    for tm in cands:
        if _resident_vmem_bytes(tm, C, H) <= budget:
            return True, tm, H

    # Otherwise stream weight tiles along the hidden axis; largest th first.
    th_cands = [t for t in (4096, 2048, 1024, 512, 256, 128)
                if t <= H and H % t == 0]
    for tm in cands:
        for th in th_cands:
            if _stream_vmem_bytes(tm, th, C, H) <= budget:
                return False, tm, th
    return False, 16, 128                   # last resort


# ------------------------------ forward --------------------------------------


@functools.partial(jax.jit,
                   static_argnames=("tm", "th", "resident", "vmem_limit"))
def _cmix_forward(x, x_k, w_key, w_value, *, tm, th, resident, vmem_limit):
    B, T, C = x.shape
    H = w_key.shape[1]
    M = B * T

    # ZeroPad2d((0, 0, 1, -1)): shift tokens one step forward along T.
    shifted = jnp.concatenate([jnp.zeros_like(x[:, :1]), x[:, :-1]], axis=1)
    xk = x_k.reshape(1, 1, -1).astype(x.dtype)
    k = (x + (shifted - x) * xk).astype(jnp.bfloat16)     # single bf16 operand
    k2 = k.reshape(M, C)

    Mp = _round_up(M, tm)
    if Mp != M:                                            # small bf16 pad only
        k2 = jnp.pad(k2, ((0, Mp - M), (0, 0)))

    wk = w_key.astype(jnp.bfloat16)
    wv = w_value.astype(jnp.bfloat16)

    if resident:
        grid = (Mp // tm,)
        in_specs = [
            pl.BlockSpec((tm, C), lambda i: (i, 0)),       # k rows
            pl.BlockSpec((C, H), lambda i: (0, 0)),        # Wk, resident
            pl.BlockSpec((H, C), lambda i: (0, 0)),        # Wv, resident
        ]
        out_specs = pl.BlockSpec((tm, C), lambda i: (i, 0))
        scratch_shapes = []
        kernel = _cmix_resident_kernel
        dim_sem = ("parallel",)
    else:
        grid = (Mp // tm, H // th)
        in_specs = [
            pl.BlockSpec((tm, C), lambda i, j: (i, 0)),    # k rows (once per i)
            pl.BlockSpec((C, th), lambda i, j: (0, j)),    # Wk column tile
            pl.BlockSpec((th, C), lambda i, j: (j, 0)),    # Wv row tile
        ]
        out_specs = pl.BlockSpec((tm, C), lambda i, j: (i, 0))
        scratch_shapes = [pltpu.VMEM((tm, C), jnp.float32)]
        kernel = _cmix_stream_kernel
        dim_sem = ("parallel", "arbitrary")

    out = pl.pallas_call(
        kernel,
        out_shape=jax.ShapeDtypeStruct((Mp, C), x.dtype),
        grid_spec=pltpu.PrefetchScalarGridSpec(
            num_scalar_prefetch=0,
            grid=grid,
            in_specs=in_specs,
            out_specs=out_specs,
            scratch_shapes=scratch_shapes,
        ),
        compiler_params=pltpu.CompilerParams(
            dimension_semantics=dim_sem,
            vmem_limit_bytes=int(vmem_limit),
        ),
    )(k2, wk, wv)

    return out[:M].reshape(B, T, C)


def rwkv_cmix_x070(x, x_k, w_key, w_value, *, tm=None):
    """x: (B, T, C); x_k: (1, C) or (1, 1, C); w_key: (C, 4C); w_value: (4C, C)."""
    B, T, C = x.shape
    H = w_key.shape[1]
    assert w_key.shape == (C, H) and w_value.shape == (H, C)
    assert C % 128 == 0, "pad n_embd to a multiple of 128 for lane-dense tiles"
    assert H % 128 == 0

    budget = _vmem_budget_bytes()
    resident, tm_, th_ = _pick_tiles(B * T, C, H, tm, budget)
    return _cmix_forward(x, x_k, w_key, w_value,
                         tm=tm_, th=th_, resident=resident, vmem_limit=budget)


# ------------------------------ reference ------------------------------------


def reference_bf16(x, x_k, w_key, w_value):
    """Pure-JAX reference with the same bf16 operand / f32 accumulation recipe."""
    shifted = jnp.concatenate([jnp.zeros_like(x[:, :1]), x[:, :-1]], axis=1)
    k = x + (shifted - x) * x_k.reshape(1, 1, -1)
    kb = k.astype(jnp.bfloat16)
    wk = w_key.astype(jnp.bfloat16)
    wv = w_value.astype(jnp.bfloat16)
    h = jnp.einsum("btc,ch->bth", kb, wk, preferred_element_type=jnp.float32)
    h = jnp.maximum(h, 0.0) ** 2
    out = jnp.einsum("bth,hc->btc", h.astype(jnp.bfloat16), wv,
                     preferred_element_type=jnp.float32)
    return out.astype(x.dtype)


if __name__ == "__main__":
    # Small but lane-aligned config: n_embd=128, hidden=4*128, T=64, B=2.
    B, T, C = 2, 64, 128
    H = 4 * C
    n_layer, layer_id = 4, 0

    key = jax.random.PRNGKey(0)
    kx, kk, kv = jax.random.split(key, 3)

    # Deterministic x_k init per the module __init__.
    ratio_1_to_almost0 = 1.0 - layer_id / n_layer
    ddd = jnp.arange(C, dtype=jnp.float32) / C                    # i / n_embd
    x_k = (1.0 - jnp.power(ddd, ratio_1_to_almost0 ** 4)).reshape(1, C)

    # Linear weights (no bias), stored pre-transposed for right-multiplication.
    w_key_mat = jax.random.normal(kk, (C, H), dtype=jnp.float32) / (C ** 0.5)
    w_value_mat = jax.random.normal(kv, (H, C), dtype=jnp.float32) / (H ** 0.5)

    x = jax.random.normal(kx, (B, T, C), dtype=jnp.float32)
    ref = reference_bf16(x, x_k, w_key_mat, w_value_mat)

    # Auto-selected path (resident weights at this size).
    out = rwkv_cmix_x070(x, x_k, w_key_mat, w_value_mat)
    out = jax.block_until_ready(out)
    assert out.shape == (B, T, C)
    err = jnp.max(jnp.abs(out - ref))
    assert jnp.allclose(out, ref, atol=1e-2, rtol=1e-2), (
        f"resident path mismatch (max abs err {err})")

    # Also exercise the streaming (weight-tiled) path explicitly.
    out_s = _cmix_forward(x, x_k, w_key_mat, w_value_mat,
                          tm=64, th=128, resident=False,
                          vmem_limit=32 * 1024 * 1024)
    out_s = jax.block_until_ready(out_s)
    err_s = jnp.max(jnp.abs(out_s - ref))
    assert jnp.allclose(out_s, ref, atol=1e-2, rtol=1e-2), (
        f"streaming path mismatch (max abs err {err_s})")

    print("KERNEL_OK")
</pallas_src>

<mosaic_0001>
module attributes {stable_mosaic.version = 11 : i64} {
  func.func @_cmix_resident_kernel(%arg0: i32, %arg1: memref<128x128xbf16, #tpu.memory_space<vmem>>, %arg2: memref<128x512xbf16, #tpu.memory_space<vmem>>, %arg3: memref<512x128xbf16, #tpu.memory_space<vmem>>, %arg4: memref<128x128xf32, #tpu.memory_space<vmem>>) attributes {dimension_semantics = [#tpu.dimension_semantics<parallel>], iteration_bounds = array<i64: 1>, scalar_prefetch = 0 : i64, scratch_operands = 0 : i64, tpu.core_type = #tpu.core_type<tc>, window_params = [{transform_indices = @transform_0, window_bounds = array<i64: 128, 128>}, {pipeline_mode = #tpu.pipeline_mode<synchronous>, transform_indices = @transform_1, window_bounds = array<i64: 128, 512>}, {pipeline_mode = #tpu.pipeline_mode<synchronous>, transform_indices = @transform_2, window_bounds = array<i64: 512, 128>}, {transform_indices = @transform_3, window_bounds = array<i64: 128, 128>}]} {
    %c0 = arith.constant 0 : index
    %c0_0 = arith.constant 0 : index
    %0 = vector.load %arg1[%c0, %c0_0] : memref<128x128xbf16, #tpu.memory_space<vmem>>, vector<128x128xbf16>
    %c0_1 = arith.constant 0 : index
    %c0_2 = arith.constant 0 : index
    %1 = vector.load %arg2[%c0_1, %c0_2] : memref<128x512xbf16, #tpu.memory_space<vmem>>, vector<128x512xbf16>
    %cst = arith.constant dense<0.000000e+00> : vector<128x512xf32>
    %2 = tpu.matmul %0, %1, %cst {dimension_numbers = #tpu.dot_dimension_numbers<[1], [0], [0], [1], [0, 0, 1, 1], [], []>} : vector<128x128xbf16>, vector<128x512xbf16>, vector<128x512xf32> -> vector<128x512xf32>
    %cst_3 = arith.constant 0.000000e+00 : f32
    %3 = vector.broadcast %cst_3 : f32 to vector<128x512xf32>
    %4 = arith.maximumf %2, %3 : vector<128x512xf32>
    %5 = arith.mulf %4, %4 : vector<128x512xf32>
    %6 = arith.truncf %5 : vector<128x512xf32> to vector<128x512xbf16>
    %c0_4 = arith.constant 0 : index
    %c0_5 = arith.constant 0 : index
    %7 = vector.load %arg3[%c0_4, %c0_5] : memref<512x128xbf16, #tpu.memory_space<vmem>>, vector<512x128xbf16>
    %cst_6 = arith.constant dense<0.000000e+00> : vector<128x128xf32>
    %8 = tpu.matmul %6, %7, %cst_6 {dimension_numbers = #tpu.dot_dimension_numbers<[1], [0], [0], [1], [0, 0, 1, 1], [], []>} : vector<128x512xbf16>, vector<512x128xbf16>, vector<128x128xf32> -> vector<128x128xf32>
    %c0_7 = arith.constant 0 : index
    %c0_8 = arith.constant 0 : index
    %9 = vector.load %arg4[%c0_7, %c0_8] : memref<128x128xf32, #tpu.memory_space<vmem>>, vector<128x128xf32>
    tpu.vector_store %arg4[%c0_7, %c0_8], %8 {strides = array<i32>} : memref<128x128xf32, #tpu.memory_space<vmem>>, vector<128x128xf32>,
    return
  }
  func.func @transform_0(%arg0: i32) -> (i32, i32) {
    %c0_i32 = arith.constant 0 : i32
    %c0_i32_0 = arith.constant 0 : i32
    return %arg0, %c0_i32 : i32, i32
  }
  func.func @transform_1(%arg0: i32) -> (i32, i32) {
    %c0_i32 = arith.constant 0 : i32
    %c0_i32_0 = arith.constant 0 : i32
    %c0_i32_1 = arith.constant 0 : i32
    return %c0_i32, %c0_i32_0 : i32, i32
  }
  func.func @transform_2(%arg0: i32) -> (i32, i32) {
    %c0_i32 = arith.constant 0 : i32
    %c0_i32_0 = arith.constant 0 : i32
    %c0_i32_1 = arith.constant 0 : i32
    return %c0_i32, %c0_i32_0 : i32, i32
  }
  func.func @transform_3(%arg0: i32) -> (i32, i32) {
    %c0_i32 = arith.constant 0 : i32
    %c0_i32_0 = arith.constant 0 : i32
    return %arg0, %c0_i32 : i32, i32
  }
}

</mosaic_0001>

<bundles_post_ra>
// kernel: _cmix_forward.1
= control target key start
LH: loop header
LB: loop body
LE: loop exit
PB: predicated region body
PF: predicated region fallthrough
CT: control target
= control target key end

     0   :  { %v1456_v2 = vmov 0   ;;  %s1724_s0 = inlined_call_operand.vmem [shape: bf16[128,128], index: 0, kind: input, shape index: {}]   ;;  %s1725_s1 = inlined_call_operand.vmem [shape: bf16[128,512], index: 1, kind: input, shape index: {}]   ;;  %s1726_s2 = inlined_call_operand.vmem [shape: bf16[512,128], index: 2, kind: input, shape index: {}]   ;;  %s1727_s3 = inlined_call_operand.hbm [shape: f32[128,128], index: 3, kind: output, shape index: {}]  }
   0x1   :  { %v1344_v0 = vld [vmem:[%s1725_s1 + $0x4] ss:$16 sps:$4 sm:$0xff]   ;;  %v1346_v1 = vld [vmem:[%s1725_s1 + $0xc] ss:$16 sps:$4 sm:$0xff]   ;;  %304 = vmatprep.mubr.bf16.mxu0 %v1456_v2  ;;  %417 = vmatprep.mubr.bf16.mxu1 %v1456_v2  ;;  %v1348_v3 = vld [vmem:[%s1725_s1] ss:$16 sps:$4 sm:$0xff]  }
   0x2   :  { %272 = vmatprep.subr.bf16.mxu0 %v1344_v0  ;;  %v1349_v4 = vld [vmem:[%s1725_s1 + $0x8] ss:$16 sps:$4 sm:$0xff]   ;;  %385 = vmatprep.subr.bf16.mxu1 %v1346_v1  ;;  %v1350_v5 = vld [vmem:[%s1725_s1 + $0x24] ss:$16 sps:$4 sm:$0xff]   ;;  %v1352_v6 = vld [vmem:[%s1725_s1 + $0x2c] ss:$16 sps:$4 sm:$0xff]  }
   0x3   :  { %273 = vmatpush1.bf16.msra.mxu0 %v1348_v3  ;;  %386 = vmatpush1.bf16.msra.mxu1 %v1349_v4  ;;  %v1354_v7 = vld [vmem:[%s1725_s1 + $0x20] ss:$16 sps:$4 sm:$0xff]   ;;  %v1355_v8 = vld [vmem:[%s1725_s1 + $0x28] ss:$16 sps:$4 sm:$0xff]   ;;  %v1356_v9 = vld [vmem:[%s1725_s1 + $0x44] ss:$16 sps:$4 sm:$0xff]  }
   0x4   :  { %274 = vmatprep.subr.bf16.mxu0 %v1350_v5  ;;  %387 = vmatprep.subr.bf16.mxu1 %v1352_v6  ;;  %v1358_v10 = vld [vmem:[%s1725_s1 + $0x4c] ss:$16 sps:$4 sm:$0xff]   ;;  %v1360_v11 = vld [vmem:[%s1725_s1 + $0x40] ss:$16 sps:$4 sm:$0xff]   ;;  %v1361_v12 = vld [vmem:[%s1725_s1 + $0x48] ss:$16 sps:$4 sm:$0xff]  }
   0x5   :  { %v1362_v13 = vld [vmem:[%s1725_s1 + $0x64] ss:$16 sps:$4 sm:$0xff]   ;;  %v1364_v14 = vld [vmem:[%s1725_s1 + $0x6c] ss:$16 sps:$4 sm:$0xff]   ;;  %v1366_v15 = vld [vmem:[%s1725_s1 + $0x60] ss:$16 sps:$4 sm:$0xff]  }
   0x6   :  { %v1367_v16 = vld [vmem:[%s1725_s1 + $0x68] ss:$16 sps:$4 sm:$0xff]   ;;  %v1368_v17 = vld [vmem:[%s1725_s1 + $0x84] ss:$16 sps:$4 sm:$0xff]   ;;  %v1370_v18 = vld [vmem:[%s1725_s1 + $0x8c] ss:$16 sps:$4 sm:$0xff]  }
   0x7   :  { %275 = vmatpush1.bf16.msra.mxu0 %v1354_v7  ;;  %388 = vmatpush1.bf16.msra.mxu1 %v1355_v8  ;;  %v1372_v19 = vld [vmem:[%s1725_s1 + $0x80] ss:$16 sps:$4 sm:$0xff]   ;;  %v1373_v20 = vld [vmem:[%s1725_s1 + $0x88] ss:$16 sps:$4 sm:$0xff]   ;;  %v1374_v21 = vld [vmem:[%s1725_s1 + $0xa4] ss:$16 sps:$4 sm:$0xff]  }
   0x8   :  { %276 = vmatprep.subr.bf16.mxu0 %v1356_v9  ;;  %389 = vmatprep.subr.bf16.mxu1 %v1358_v10  ;;  %v1376_v22 = vld [vmem:[%s1725_s1 + $0xac] ss:$16 sps:$4 sm:$0xff]   ;;  %v1378_v23 = vld [vmem:[%s1725_s1 + $0xa0] ss:$16 sps:$4 sm:$0xff]   ;;  %v1379_v24 = vld [vmem:[%s1725_s1 + $0xa8] ss:$16 sps:$4 sm:$0xff]  }
   0x9   :  { %v1380_v25 = vld [vmem:[%s1725_s1 + $0xc4] ss:$16 sps:$4 sm:$0xff]   ;;  %v1382_v26 = vld [vmem:[%s1725_s1 + $0xcc] ss:$16 sps:$4 sm:$0xff]   ;;  %v1384_v27 = vld [vmem:[%s1725_s1 + $0xc0] ss:$16 sps:$4 sm:$0xff]  }
   0xa   :  { %v1385_v28 = vld [vmem:[%s1725_s1 + $0xc8] ss:$16 sps:$4 sm:$0xff]   ;;  %v1386_v29 = vld [vmem:[%s1725_s1 + $0xe4] ss:$16 sps:$4 sm:$0xff]   ;;  %v1388_v30 = vld [vmem:[%s1725_s1 + $0xec] ss:$16 sps:$4 sm:$0xff]  }
   0xb   :  { %277 = vmatpush1.bf16.msra.mxu0 %v1360_v11  ;;  %390 = vmatpush1.bf16.msra.mxu1 %v1361_v12  ;;  %v1390_v31 = vld [vmem:[%s1725_s1 + $0xe0] ss:$16 sps:$4 sm:$0xff]   ;;  %v1391_v32 = vld [vmem:[%s1725_s1 + $0xe8] ss:$16 sps:$4 sm:$0xff]  }
   0xc   :  { %278 = vmatprep.subr.bf16.mxu0 %v1362_v13  ;;  %391 = vmatprep.subr.bf16.mxu1 %v1364_v14  ;;  %v1392_v33 = vld [vmem:[%s1724_s0] sm:$0xff]   ;;  %v1404_v38 = vld [vmem:[%s1726_s2 + $0x48] sm:$0xff]   ;;  %v1408_v43 = vld [vmem:[%s1726_s2 + $0x50] sm:$0xff]  }
   0xd   :  { %v1400_v34 = vld [vmem:[%s1726_s2 + $0x40] sm:$0xff]   ;;  %v1405_v39 = vld [vmem:[%s1726_s2 + $0xc8] sm:$0xff]   ;;  %v1409_v44 = vld [vmem:[%s1726_s2 + $0xd0] sm:$0xff]  }
   0xe   :  { %v1401_v35 = vld [vmem:[%s1726_s2 + $0xc0] sm:$0xff]   ;;  %v1406_v40 = vld [vmem:[%s1726_s2 + $0x8] sm:$0xff]   ;;  %v1410_v45 = vld [vmem:[%s1726_s2 + $0x10] sm:$0xff]  }
   0xf   :  { %279 = vmatpush1.bf16.msra.mxu0 %v1366_v15  ;;  %392 = vmatpush1.bf16.msra.mxu1 %v1367_v16  ;;  %v1402_v36 = vld [vmem:[%s1726_s2] sm:$0xff]   ;;  %v1393_v41 = vld [vmem:[%s1724_s0 + $0x8] sm:$0xff]   ;;  %v1411_v46 = vld [vmem:[%s1726_s2 + $0x90] sm:$0xff]  }
  0x10   :  { %280 = vmatprep.subr.bf16.mxu0 %v1368_v17  ;;  %393 = vmatprep.subr.bf16.mxu1 %v1370_v18  ;;  %v1403_v37 = vld [vmem:[%s1726_s2 + $0x80] sm:$0xff]   ;;  %v1407_v42 = vld [vmem:[%s1726_s2 + $0x88] sm:$0xff]   ;;  %v1412_v47 = vld [vmem:[%s1726_s2 + $0x58] sm:$0xff]  }
  0x11   :  { %v1413_v48 = vld [vmem:[%s1726_s2 + $0xd8] sm:$0xff]   ;;  %v1394_v50 = vld [vmem:[%s1724_s0 + $0x10] sm:$0xff]   ;;  %v1416_v52 = vld [vmem:[%s1726_s2 + $0x60] sm:$0xff]  }
  0x12   :  { %v1414_v49 = vld [vmem:[%s1726_s2 + $0x18] sm:$0xff]   ;;  %v1417_v53 = vld [vmem:[%s1726_s2 + $0xe0] sm:$0xff]   ;;  %v1420_v56 = vld [vmem:[%s1726_s2 + $0x68] sm:$0xff]  }
  0x13   :  { %281 = vmatpush1.bf16.msra.mxu0 %v1372_v19  ;;  %394 = vmatpush1.bf16.msra.mxu1 %v1373_v20  ;;  %v1415_v51 = vld [vmem:[%s1726_s2 + $0x98] sm:$0xff]   ;;  %v1418_v54 = vld [vmem:[%s1726_s2 + $0x20] sm:$0xff]   ;;  %v1421_v57 = vld [vmem:[%s1726_s2 + $0xe8] sm:$0xff]  }
  0x14   :  { %282 = vmatprep.subr.bf16.mxu0 %v1374_v21  ;;  %395 = vmatprep.subr.bf16.mxu1 %v1376_v22  ;;  %v1419_v55 = vld [vmem:[%s1726_s2 + $0xa0] sm:$0xff]   ;;  %v1422_v58 = vld [vmem:[%s1726_s2 + $0x28] sm:$0xff]   ;;  %v1395_v59 = vld [vmem:[%s1724_s0 + $0x18] sm:$0xff]  }
  0x15   :  { %v1423_v60 = vld [vmem:[%s1726_s2 + $0xa8] sm:$0xff]   ;;  %v1424_v61 = vld [vmem:[%s1726_s2 + $0x70] sm:$0xff]  }
  0x16   :  { %v1425_v62 = vld [vmem:[%s1726_s2 + $0xf0] sm:$0xff]  }
  0x17   :  { %283 = vmatpush1.bf16.msra.mxu0 %v1378_v23  ;;  %396 = vmatpush1.bf16.msra.mxu1 %v1379_v24  ;;  %v1426_v63 = vld [vmem:[%s1726_s2 + $0x30] sm:$0xff]  }
  0x18   :  { %284 = vmatprep.subr.bf16.mxu0 %v1380_v25  ;;  %397 = vmatprep.subr.bf16.mxu1 %v1382_v26  ;;  %v1427_v0 = vld [vmem:[%s1726_s2 + $0xb0] sm:$0xff]  }
  0x1b   :  { %285 = vmatpush1.bf16.msra.mxu0 %v1384_v27  ;;  %398 = vmatpush1.bf16.msra.mxu1 %v1385_v28 }
  0x1c   :  { %286 = vmatprep.subr.bf16.mxu0 %v1386_v29  ;;  %399 = vmatprep.subr.bf16.mxu1 %v1388_v30 }
  0x1f   :  { %287 = vmatpush1.bf16.msra.mxu0 %v1390_v31  ;;  %400 = vmatpush1.bf16.msra.mxu1 %v1391_v32 }
  0x20   :  { %1212 = vmatprep.subr.bf16.mxu0 %v1400_v34  ;;  %1276 = vmatprep.subr.bf16.mxu1 %v1401_v35 }
  0x22   :  { %305 = vmatmul.mubr.bf16.vlgmr.msra.gmra.mrb[0].mxu0 %v1392_v33  ;;  %418 = vmatmul.mubr.bf16.vlgmr.msra.gmra.mrb[0].mxu1 %v1392_v33 }
  0x23   :  { %314 = vmatprep.mubr.bf16.mxu0 %v1456_v2  ;;  %427 = vmatprep.mubr.bf16.mxu1 %v1456_v2 }
  0x24   :  { %1213 = vmatpush3.bf16.msra.mxu0 %v1402_v36  ;;  %1277 = vmatpush3.bf16.msra.mxu1 %v1403_v37 }
  0x25   :  { %1214 = vmatprep.subr.bf16.mxu0 %v1404_v38  ;;  %1278 = vmatprep.subr.bf16.mxu1 %v1405_v39 }
  0x28   :  { %1215 = vmatpush3.bf16.msra.mxu0 %v1406_v40  ;;  %1279 = vmatpush3.bf16.msra.mxu1 %v1407_v42 }
  0x29   :  { %1216 = vmatprep.subr.bf16.mxu0 %v1408_v43  ;;  %1280 = vmatprep.subr.bf16.mxu1 %v1409_v44 }
  0x2a   :  { %315 = vmatmul.mubr.bf16.gmra.mrb[4].mxu0 %v1393_v41  ;;  %428 = vmatmul.mubr.bf16.gmra.mrb[4].mxu1 %v1393_v41 }
  0x2b   :  { %324 = vmatprep.mubr.bf16.mxu0 %v1456_v2  ;;  %437 = vmatprep.mubr.bf16.mxu1 %v1456_v2 }
  0x2c   :  { %1217 = vmatpush3.bf16.msra.mxu0 %v1410_v45  ;;  %1281 = vmatpush3.bf16.msra.mxu1 %v1411_v46 }
  0x2d   :  { %1218 = vmatprep.subr.bf16.mxu0 %v1412_v47  ;;  %1282 = vmatprep.subr.bf16.mxu1 %v1413_v48 }
  0x30   :  { %1219 = vmatpush3.bf16.msra.mxu0 %v1414_v49  ;;  %1283 = vmatpush3.bf16.msra.mxu1 %v1415_v51 }
  0x31   :  { %1220 = vmatprep.subr.bf16.mxu0 %v1416_v52  ;;  %1284 = vmatprep.subr.bf16.mxu1 %v1417_v53 }
  0x32   :  { %325 = vmatmul.mubr.bf16.gmra.mrb[8].mxu0 %v1394_v50  ;;  %438 = vmatmul.mubr.bf16.gmra.mrb[8].mxu1 %v1394_v50 }
  0x33   :  { %334 = vmatprep.mubr.bf16.mxu0 %v1456_v2  ;;  %447 = vmatprep.mubr.bf16.mxu1 %v1456_v2 }
  0x34   :  { %1221 = vmatpush3.bf16.msra.mxu0 %v1418_v54  ;;  %1285 = vmatpush3.bf16.msra.mxu1 %v1419_v55 }
  0x35   :  { %1222 = vmatprep.subr.bf16.mxu0 %v1420_v56  ;;  %1286 = vmatprep.subr.bf16.mxu1 %v1421_v57 }
  0x38   :  { %1223 = vmatpush3.bf16.msra.mxu0 %v1422_v58  ;;  %1287 = vmatpush3.bf16.msra.mxu1 %v1423_v60 }
  0x39   :  { %1224 = vmatprep.subr.bf16.mxu0 %v1424_v61  ;;  %1288 = vmatprep.subr.bf16.mxu1 %v1425_v62 }
  0x3a   :  { %335 = vmatmul.mubr.bf16.gmra.mrb[12].mxu0 %v1395_v59  ;;  %448 = vmatmul.mubr.bf16.gmra.mrb[12].mxu1 %v1395_v59 }
  0x3b   :  { %344 = vmatprep.mubr.bf16.mxu0 %v1456_v2  ;;  %457 = vmatprep.mubr.bf16.mxu1 %v1456_v2 }
  0x3c   :  { %8 = vsyncpa [#allocation3], 0  ;;  %1225 = vmatpush3.bf16.msra.mxu0 %v1426_v63  ;;  %1289 = vmatpush3.bf16.msra.mxu1 %v1427_v0  ;;  %v1396_v1 = vld [vmem:[%s1724_s0 + $0x20] sm:$0xff]   ;;  %v1397_v3 = vld [vmem:[%s1724_s0 + $0x28] sm:$0xff]  }
  0x3d   :  { %v1398_v4 = vld [vmem:[%s1724_s0 + $0x30] sm:$0xff]   ;;  %v1399_v5 = vld [vmem:[%s1724_s0 + $0x38] sm:$0xff]   ;;  %s1457_s0 = smov [#allocation2]  }
  0x3e   :  { %v1428_v6 = vld [vmem:[%s1726_s2 + $0x78] sm:$0xff]  }
  0x3f   :  { %v1429_v7 = vld [vmem:[%s1726_s2 + $0xf8] sm:$0xff]   ;;  %1226 = vmatprep.subr.bf16.mxu0 %v1428_v6 }
  0x40   :  { %v1430_v8 = vld [vmem:[%s1726_s2 + $0x38] sm:$0xff]   ;;  %1290 = vmatprep.subr.bf16.mxu1 %v1429_v7 }
  0x41   :  { %1227 = vmatpush3.bf16.msra.mxu0 %v1430_v8 }
  0x42   :  { %345 = vmatmul.mubr.bf16.gmra.mrb[16].mxu0 %v1396_v1  ;;  %458 = vmatmul.mubr.bf16.gmra.mrb[16].mxu1 %v1396_v1 }
  0x43   :  { %354 = vmatprep.mubr.bf16.mxu0 %v1456_v2  ;;  %467 = vmatprep.mubr.bf16.mxu1 %v1456_v2 }
  0x4a   :  { %355 = vmatmul.mubr.bf16.gmra.mrb[20].mxu0 %v1397_v3  ;;  %468 = vmatmul.mubr.bf16.gmra.mrb[20].mxu1 %v1397_v3 }
  0x4b   :  { %364 = vmatprep.mubr.bf16.mxu0 %v1456_v2  ;;  %477 = vmatprep.mubr.bf16.mxu1 %v1456_v2 }
  0x52   :  { %365 = vmatmul.mubr.bf16.gmra.mrb[24].mxu0 %v1398_v4  ;;  %478 = vmatmul.mubr.bf16.gmra.mrb[24].mxu1 %v1398_v4 }
  0x53   :  { %374 = vmatprep.mubr.bf16.mxu0 %v1456_v2  ;;  %487 = vmatprep.mubr.bf16.mxu1 %v1456_v2  ;;  %v1431_v2 = vld [vmem:[%s1726_s2 + $0xb8] sm:$0xff]   ;;  %s1129_s2 = sshll.u32 %s1457_s0, 4  ;;  %s1130_s2 = int_to_ptr.vmem [resolvable:$true] %s1129_s2 }
  0x54   :  { %1291 = vmatpush3.bf16.msra.mxu1 %v1431_v2  ;;  %s1432_s18 = scalar_lea.vmem %s1130_s2, 2048  ;;  %p1437_p1 = scmp.lt.s32.totalorder %s1130_s2, %s1130_s2 }
  0x55   :  { %p1433_p0 = scmp.ne.s32.totalorder %s1130_s2, %s1432_s18  ;;  %p1438_p2 = scmp.lt.s32.totalorder %s1432_s18, %s1432_s18 }
  0x57   :  { %p1439_p3 = por %p1438_p2, %p1437_p1 }
  0x59   :  { %p1440_p4 = pnand %p1439_p3, %p1433_p0 }
  0x5a   :  { %375 = vmatmul.mubr.bf16.gmra.mrb[28].mxu0 %v1399_v5  ;;  %488 = vmatmul.mubr.bf16.gmra.mrb[28].mxu1 %v1399_v5 }
  0xf5   :  { %v306_v9 = vpop.f32.mrb[0].mxu0  ;;  %v419_v10 = vpop.f32.mrb[0].mxu1 }
  0xf6   :  { %v498_v11 = vmax.f32 %v306_v9, 0.0  ;;  %v500_v12 = vmax.f32 %v419_v10, 0.0  ;;  %v308_v13 = vpop.f32.mrb[1].mxu0  ;;  %v421_v14 = vpop.f32.mrb[1].mxu1 }
  0xf7   :  { %v499_v15 = vmax.f32 %v308_v13, 0.0  ;;  %v501_v16 = vmax.f32 %v421_v14, 0.0  ;;  %v310_v17 = vpop.f32.mrb[2].mxu0  ;;  %v423_v18 = vpop.f32.mrb[2].mxu1 }
  0xf8   :  { %v502_v19 = vmax.f32 %v310_v17, 0.0  ;;  %v504_v20 = vmax.f32 %v423_v18, 0.0  ;;  %v312_v21 = vpop.f32.mrb[3].mxu0  ;;  %v425_v22 = vpop.f32.mrb[3].mxu1  ;;  %v562_v25 = vmul.f32 %v498_v11, %v498_v11  ;;  %v564_v26 = vmul.f32 %v500_v12, %v500_v12 }
  0xf9   :  { %v503_v23 = vmax.f32 %v312_v21, 0.0  ;;  %v505_v24 = vmax.f32 %v425_v22, 0.0  ;;  %v563_v29 = vmul.f32 %v499_v15, %v499_v15  ;;  %v565_v30 = vmul.f32 %v501_v16, %v501_v16 }
  0xfa   :  { %v566_v27 = vmul.f32 %v502_v19, %v502_v19  ;;  %v568_v28 = vmul.f32 %v504_v20, %v504_v20 }
  0xfb   :  { %v567_v31 = vmul.f32 %v503_v23, %v503_v23  ;;  %v569_v32 = vmul.f32 %v505_v24, %v505_v24 }
  0xfc   :  { %v626_v33 = vpack.c.bf16 %v566_v27, %v562_v25  ;;  %v628_v34 = vpack.c.bf16 %v568_v28, %v564_v26 }
  0xfd   :  { %v627_v35 = vpack.c.bf16 %v567_v31, %v563_v29  ;;  %v629_v36 = vpack.c.bf16 %v569_v32, %v565_v30  ;;  %v316_v37 = vpop.f32.mrb[4].mxu0  ;;  %v429_v38 = vpop.f32.mrb[4].mxu1 }
  0xfe   :  { %v506_v39 = vmax.f32 %v316_v37, 0.0  ;;  %v508_v40 = vmax.f32 %v429_v38, 0.0  ;;  %v318_v41 = vpop.f32.mrb[5].mxu0  ;;  %v431_v42 = vpop.f32.mrb[5].mxu1 }
  0xff   :  { %v507_v43 = vmax.f32 %v318_v41, 0.0  ;;  %v509_v44 = vmax.f32 %v431_v42, 0.0  ;;  %v320_v45 = vpop.f32.mrb[6].mxu0  ;;  %v433_v46 = vpop.f32.mrb[6].mxu1  ;;  %946 = vmatprep.mubr.bf16.mxu0 %v627_v35  ;;  %1043 = vmatprep.mubr.bf16.mxu1 %v629_v36 }
 0x100   :  { %v510_v47 = vmax.f32 %v320_v45, 0.0  ;;  %v512_v48 = vmax.f32 %v433_v46, 0.0  ;;  %v322_v49 = vpop.f32.mrb[7].mxu0  ;;  %v435_v50 = vpop.f32.mrb[7].mxu1  ;;  %947 = vmatmul.mubr.bf16.vlgmr.msra.gmra.mrb[32].mxu0 %v626_v33  ;;  %1044 = vmatmul.mubr.bf16.vlgmr.msra.gmra.mrb[32].mxu1 %v628_v34  ;;  %v570_v53 = vmul.f32 %v506_v39, %v506_v39  ;;  %v572_v54 = vmul.f32 %v508_v40, %v508_v40 }
 0x101   :  { %v511_v51 = vmax.f32 %v322_v49, 0.0  ;;  %v513_v52 = vmax.f32 %v435_v50, 0.0  ;;  %v571_v57 = vmul.f32 %v507_v43, %v507_v43  ;;  %v573_v58 = vmul.f32 %v509_v44, %v509_v44 }
 0x102   :  { %v574_v55 = vmul.f32 %v510_v47, %v510_v47  ;;  %v576_v56 = vmul.f32 %v512_v48, %v512_v48 }
 0x103   :  { %v575_v59 = vmul.f32 %v511_v51, %v511_v51  ;;  %v577_v60 = vmul.f32 %v513_v52, %v513_v52 }
 0x104   :  { %v630_v61 = vpack.c.bf16 %v574_v55, %v570_v53  ;;  %v632_v62 = vpack.c.bf16 %v576_v56, %v572_v54 }
 0x105   :  { %v631_v63 = vpack.c.bf16 %v575_v59, %v571_v57  ;;  %v633_v0 = vpack.c.bf16 %v577_v60, %v573_v58  ;;  %v326_v1 = vpop.f32.mrb[8].mxu0  ;;  %v439_v3 = vpop.f32.mrb[8].mxu1 }
 0x106   :  { %v514_v4 = vmax.f32 %v326_v1, 0.0  ;;  %v516_v5 = vmax.f32 %v439_v3, 0.0  ;;  %v328_v6 = vpop.f32.mrb[9].mxu0  ;;  %v441_v7 = vpop.f32.mrb[9].mxu1 }
 0x107   :  { %v515_v8 = vmax.f32 %v328_v6, 0.0  ;;  %v517_v2 = vmax.f32 %v441_v7, 0.0  ;;  %v330_v9 = vpop.f32.mrb[10].mxu0  ;;  %v443_v10 = vpop.f32.mrb[10].mxu1  ;;  %954 = vmatprep.mubr.bf16.mxu0 %v631_v63  ;;  %1051 = vmatprep.mubr.bf16.mxu1 %v633_v0 }
 0x108   :  { %v518_v11 = vmax.f32 %v330_v9, 0.0  ;;  %v520_v12 = vmax.f32 %v443_v10, 0.0  ;;  %v332_v13 = vpop.f32.mrb[11].mxu0  ;;  %v445_v14 = vpop.f32.mrb[11].mxu1  ;;  %955 = vmatmul.mubr.bf16.gmra.mrb[36].mxu0 %v630_v61  ;;  %1052 = vmatmul.mubr.bf16.gmra.mrb[36].mxu1 %v632_v62  ;;  %v578_v17 = vmul.f32 %v514_v4, %v514_v4  ;;  %v580_v18 = vmul.f32 %v516_v5, %v516_v5 }
 0x109   :  { %v519_v15 = vmax.f32 %v332_v13, 0.0  ;;  %v521_v16 = vmax.f32 %v445_v14, 0.0  ;;  %v579_v21 = vmul.f32 %v515_v8, %v515_v8  ;;  %v581_v22 = vmul.f32 %v517_v2, %v517_v2 }
 0x10a   :  { %v582_v19 = vmul.f32 %v518_v11, %v518_v11  ;;  %v584_v20 = vmul.f32 %v520_v12, %v520_v12 }
 0x10b   :  { %v583_v23 = vmul.f32 %v519_v15, %v519_v15  ;;  %v585_v24 = vmul.f32 %v521_v16, %v521_v16 }
 0x10c   :  { %v634_v25 = vpack.c.bf16 %v582_v19, %v578_v17  ;;  %v636_v26 = vpack.c.bf16 %v584_v20, %v580_v18 }
 0x10d   :  { %v635_v27 = vpack.c.bf16 %v583_v23, %v579_v21  ;;  %v637_v28 = vpack.c.bf16 %v585_v24, %v581_v22  ;;  %v336_v29 = vpop.f32.mrb[12].mxu0  ;;  %v449_v30 = vpop.f32.mrb[12].mxu1 }
 0x10e   :  { %v522_v31 = vmax.f32 %v336_v29, 0.0  ;;  %v524_v32 = vmax.f32 %v449_v30, 0.0  ;;  %v338_v33 = vpop.f32.mrb[13].mxu0  ;;  %v451_v34 = vpop.f32.mrb[13].mxu1 }
 0x10f   :  { %v523_v35 = vmax.f32 %v338_v33, 0.0  ;;  %v525_v36 = vmax.f32 %v451_v34, 0.0  ;;  %v340_v37 = vpop.f32.mrb[14].mxu0  ;;  %v453_v38 = vpop.f32.mrb[14].mxu1  ;;  %962 = vmatprep.mubr.bf16.mxu0 %v635_v27  ;;  %1059 = vmatprep.mubr.bf16.mxu1 %v637_v28 }
 0x110   :  { %v526_v39 = vmax.f32 %v340_v37, 0.0  ;;  %v528_v40 = vmax.f32 %v453_v38, 0.0  ;;  %v342_v41 = vpop.f32.mrb[15].mxu0  ;;  %v455_v42 = vpop.f32.mrb[15].mxu1  ;;  %963 = vmatmul.mubr.bf16.gmra.mrb[40].mxu0 %v634_v25  ;;  %1060 = vmatmul.mubr.bf16.gmra.mrb[40].mxu1 %v636_v26  ;;  %v586_v45 = vmul.f32 %v522_v31, %v522_v31  ;;  %v588_v46 = vmul.f32 %v524_v32, %v524_v32 }
 0x111   :  { %v527_v43 = vmax.f32 %v342_v41, 0.0  ;;  %v529_v44 = vmax.f32 %v455_v42, 0.0  ;;  %v587_v49 = vmul.f32 %v523_v35, %v523_v35  ;;  %v589_v50 = vmul.f32 %v525_v36, %v525_v36 }
 0x112   :  { %v590_v47 = vmul.f32 %v526_v39, %v526_v39  ;;  %v592_v48 = vmul.f32 %v528_v40, %v528_v40 }
 0x113   :  { %v591_v51 = vmul.f32 %v527_v43, %v527_v43  ;;  %v593_v52 = vmul.f32 %v529_v44, %v529_v44 }
 0x114   :  { %v638_v53 = vpack.c.bf16 %v590_v47, %v586_v45  ;;  %v640_v54 = vpack.c.bf16 %v592_v48, %v588_v46 }
 0x115   :  { %v639_v55 = vpack.c.bf16 %v591_v51, %v587_v49  ;;  %v641_v56 = vpack.c.bf16 %v593_v52, %v589_v50  ;;  %v346_v57 = vpop.f32.mrb[16].mxu0  ;;  %v459_v58 = vpop.f32.mrb[16].mxu1 }
 0x116   :  { %v530_v59 = vmax.f32 %v346_v57, 0.0  ;;  %v532_v60 = vmax.f32 %v459_v58, 0.0  ;;  %v348_v61 = vpop.f32.mrb[17].mxu0  ;;  %v461_v62 = vpop.f32.mrb[17].mxu1 }
 0x117   :  { %v531_v63 = vmax.f32 %v348_v61, 0.0  ;;  %v533_v0 = vmax.f32 %v461_v62, 0.0  ;;  %v350_v1 = vpop.f32.mrb[18].mxu0  ;;  %v463_v3 = vpop.f32.mrb[18].mxu1  ;;  %970 = vmatprep.mubr.bf16.mxu0 %v639_v55  ;;  %1067 = vmatprep.mubr.bf16.mxu1 %v641_v56 }
 0x118   :  { %v534_v4 = vmax.f32 %v350_v1, 0.0  ;;  %v536_v5 = vmax.f32 %v463_v3, 0.0  ;;  %v352_v6 = vpop.f32.mrb[19].mxu0  ;;  %v465_v7 = vpop.f32.mrb[19].mxu1  ;;  %971 = vmatmul.mubr.bf16.gmra.mrb[44].mxu0 %v638_v53  ;;  %1068 = vmatmul.mubr.bf16.gmra.mrb[44].mxu1 %v640_v54  ;;  %v594_v9 = vmul.f32 %v530_v59, %v530_v59  ;;  %v596_v10 = vmul.f32 %v532_v60, %v532_v60 }
 0x119   :  { %v535_v8 = vmax.f32 %v352_v6, 0.0  ;;  %v537_v2 = vmax.f32 %v465_v7, 0.0  ;;  %v595_v13 = vmul.f32 %v531_v63, %v531_v63  ;;  %v597_v14 = vmul.f32 %v533_v0, %v533_v0 }
 0x11a   :  { %v598_v11 = vmul.f32 %v534_v4, %v534_v4  ;;  %v600_v12 = vmul.f32 %v536_v5, %v536_v5 }
 0x11b   :  { %v599_v15 = vmul.f32 %v535_v8, %v535_v8  ;;  %v601_v16 = vmul.f32 %v537_v2, %v537_v2 }
 0x11c   :  { %v642_v17 = vpack.c.bf16 %v598_v11, %v594_v9  ;;  %v644_v18 = vpack.c.bf16 %v600_v12, %v596_v10 }
 0x11d   :  { %v643_v19 = vpack.c.bf16 %v599_v15, %v595_v13  ;;  %v645_v20 = vpack.c.bf16 %v601_v16, %v597_v14  ;;  %v356_v21 = vpop.f32.mrb[20].mxu0  ;;  %v469_v22 = vpop.f32.mrb[20].mxu1 }
 0x11e   :  { %v538_v23 = vmax.f32 %v356_v21, 0.0  ;;  %v540_v24 = vmax.f32 %v469_v22, 0.0  ;;  %v358_v25 = vpop.f32.mrb[21].mxu0  ;;  %v471_v26 = vpop.f32.mrb[21].mxu1 }
 0x11f   :  { %v539_v27 = vmax.f32 %v358_v25, 0.0  ;;  %v541_v28 = vmax.f32 %v471_v26, 0.0  ;;  %v360_v29 = vpop.f32.mrb[22].mxu0  ;;  %v473_v30 = vpop.f32.mrb[22].mxu1  ;;  %978 = vmatprep.mubr.bf16.mxu0 %v643_v19  ;;  %1075 = vmatprep.mubr.bf16.mxu1 %v645_v20 }
 0x120   :  { %v542_v31 = vmax.f32 %v360_v29, 0.0  ;;  %v544_v32 = vmax.f32 %v473_v30, 0.0  ;;  %v362_v33 = vpop.f32.mrb[23].mxu0  ;;  %v475_v34 = vpop.f32.mrb[23].mxu1  ;;  %979 = vmatmul.mubr.bf16.gmra.mrb[48].mxu0 %v642_v17  ;;  %1076 = vmatmul.mubr.bf16.gmra.mrb[48].mxu1 %v644_v18  ;;  %v602_v37 = vmul.f32 %v538_v23, %v538_v23  ;;  %v604_v38 = vmul.f32 %v540_v24, %v540_v24 }
 0x121   :  { %v543_v35 = vmax.f32 %v362_v33, 0.0  ;;  %v545_v36 = vmax.f32 %v475_v34, 0.0  ;;  %v603_v41 = vmul.f32 %v539_v27, %v539_v27  ;;  %v605_v42 = vmul.f32 %v541_v28, %v541_v28 }
 0x122   :  { %v606_v39 = vmul.f32 %v542_v31, %v542_v31  ;;  %v608_v40 = vmul.f32 %v544_v32, %v544_v32 }
 0x123   :  { %v607_v43 = vmul.f32 %v543_v35, %v543_v35  ;;  %v609_v44 = vmul.f32 %v545_v36, %v545_v36 }
 0x124   :  { %v646_v45 = vpack.c.bf16 %v606_v39, %v602_v37  ;;  %v648_v46 = vpack.c.bf16 %v608_v40, %v604_v38 }
 0x125   :  { %v647_v47 = vpack.c.bf16 %v607_v43, %v603_v41  ;;  %v649_v48 = vpack.c.bf16 %v609_v44, %v605_v42  ;;  %v366_v49 = vpop.f32.mrb[24].mxu0  ;;  %v479_v50 = vpop.f32.mrb[24].mxu1 }
 0x126   :  { %v546_v51 = vmax.f32 %v366_v49, 0.0  ;;  %v548_v52 = vmax.f32 %v479_v50, 0.0  ;;  %v368_v53 = vpop.f32.mrb[25].mxu0  ;;  %v481_v54 = vpop.f32.mrb[25].mxu1 }
 0x127   :  { %v547_v55 = vmax.f32 %v368_v53, 0.0  ;;  %v549_v56 = vmax.f32 %v481_v54, 0.0  ;;  %v370_v57 = vpop.f32.mrb[26].mxu0  ;;  %v483_v58 = vpop.f32.mrb[26].mxu1  ;;  %986 = vmatprep.mubr.bf16.mxu0 %v647_v47  ;;  %1083 = vmatprep.mubr.bf16.mxu1 %v649_v48 }
 0x128   :  { %v550_v59 = vmax.f32 %v370_v57, 0.0  ;;  %v552_v60 = vmax.f32 %v483_v58, 0.0  ;;  %v372_v61 = vpop.f32.mrb[27].mxu0  ;;  %v485_v62 = vpop.f32.mrb[27].mxu1  ;;  %987 = vmatmul.mubr.bf16.gmra.mrb[52].mxu0 %v646_v45  ;;  %1084 = vmatmul.mubr.bf16.gmra.mrb[52].mxu1 %v648_v46  ;;  %v610_v1 = vmul.f32 %v546_v51, %v546_v51  ;;  %v612_v3 = vmul.f32 %v548_v52, %v548_v52 }
 0x129   :  { %v551_v63 = vmax.f32 %v372_v61, 0.0  ;;  %v553_v0 = vmax.f32 %v485_v62, 0.0  ;;  %v611_v6 = vmul.f32 %v547_v55, %v547_v55  ;;  %v613_v7 = vmul.f32 %v549_v56, %v549_v56 }
 0x12a   :  { %v614_v4 = vmul.f32 %v550_v59, %v550_v59  ;;  %v616_v5 = vmul.f32 %v552_v60, %v552_v60 }
 0x12b   :  { %v615_v8 = vmul.f32 %v551_v63, %v551_v63  ;;  %v617_v2 = vmul.f32 %v553_v0, %v553_v0 }
 0x12c   :  { %v650_v9 = vpack.c.bf16 %v614_v4, %v610_v1  ;;  %v652_v10 = vpack.c.bf16 %v616_v5, %v612_v3 }
 0x12d   :  { %v651_v11 = vpack.c.bf16 %v615_v8, %v611_v6  ;;  %v653_v12 = vpack.c.bf16 %v617_v2, %v613_v7  ;;  %v376_v13 = vpop.f32.mrb[28].mxu0  ;;  %v489_v14 = vpop.f32.mrb[28].mxu1 }
 0x12e   :  { %v554_v15 = vmax.f32 %v376_v13, 0.0  ;;  %v556_v16 = vmax.f32 %v489_v14, 0.0  ;;  %v378_v17 = vpop.f32.mrb[29].mxu0  ;;  %v491_v18 = vpop.f32.mrb[29].mxu1 }
 0x12f   :  { %v555_v19 = vmax.f32 %v378_v17, 0.0  ;;  %v557_v20 = vmax.f32 %v491_v18, 0.0  ;;  %v380_v21 = vpop.f32.mrb[30].mxu0  ;;  %v493_v22 = vpop.f32.mrb[30].mxu1  ;;  %994 = vmatprep.mubr.bf16.mxu0 %v651_v11  ;;  %1091 = vmatprep.mubr.bf16.mxu1 %v653_v12 }
 0x130   :  { %v558_v23 = vmax.f32 %v380_v21, 0.0  ;;  %v560_v24 = vmax.f32 %v493_v22, 0.0  ;;  %v382_v25 = vpop.f32.mrb[31].mxu0  ;;  %v495_v26 = vpop.f32.mrb[31].mxu1  ;;  %995 = vmatmul.mubr.bf16.gmra.mrb[56].mxu0 %v650_v9  ;;  %1092 = vmatmul.mubr.bf16.gmra.mrb[56].mxu1 %v652_v10  ;;  %v618_v29 = vmul.f32 %v554_v15, %v554_v15  ;;  %v620_v30 = vmul.f32 %v556_v16, %v556_v16 }
 0x131   :  { %v559_v27 = vmax.f32 %v382_v25, 0.0  ;;  %v561_v28 = vmax.f32 %v495_v26, 0.0  ;;  %v619_v33 = vmul.f32 %v555_v19, %v555_v19  ;;  %v621_v34 = vmul.f32 %v557_v20, %v557_v20 }
 0x132   :  { %v622_v31 = vmul.f32 %v558_v23, %v558_v23  ;;  %v624_v32 = vmul.f32 %v560_v24, %v560_v24 }
 0x133   :  { %v623_v35 = vmul.f32 %v559_v27, %v559_v27  ;;  %v625_v36 = vmul.f32 %v561_v28, %v561_v28 }
 0x134   :  { %v654_v37 = vpack.c.bf16 %v622_v31, %v618_v29  ;;  %v656_v38 = vpack.c.bf16 %v624_v32, %v620_v30 }
 0x135   :  { %v655_v39 = vpack.c.bf16 %v623_v35, %v619_v33  ;;  %v657_v40 = vpack.c.bf16 %v625_v36, %v621_v34 }
 0x137   :  { %1002 = vmatprep.mubr.bf16.mxu0 %v655_v39  ;;  %1099 = vmatprep.mubr.bf16.mxu1 %v657_v40 }
 0x138   :  { %1003 = vmatmul.mubr.bf16.gmra.mrb[60].mxu0 %v654_v37  ;;  %1100 = vmatmul.mubr.bf16.gmra.mrb[60].mxu1 %v656_v38 }
 0x1d3   :  { %v1228_v41 = vpop.f32.mrb[32].mxu0  ;;  %v1292_v42 = vpop.f32.mrb[32].mxu1 }
 0x1d4   :  { %v1229_v43 = vpop.f32.mrb[33].mxu0  ;;  %v1293_v44 = vpop.f32.mrb[33].mxu1 }
 0x1d5   :  { %v1230_v45 = vadd.f32 %v1229_v43, %v1228_v41  ;;  %v1294_v46 = vadd.f32 %v1293_v44, %v1292_v42  ;;  %v1231_v47 = vpop.f32.mrb[34].mxu0  ;;  %v1295_v48 = vpop.f32.mrb[34].mxu1 }
 0x1d6   :  { %v1232_v49 = vpop.f32.mrb[35].mxu0  ;;  %v1296_v50 = vpop.f32.mrb[35].mxu1 }
 0x1d7   :  { %v1046_v51 = vadd.f32 %v1294_v46, %v1230_v45  ;;  %v1233_v52 = vadd.f32 %v1232_v49, %v1231_v47  ;;  %v1297_v53 = vadd.f32 %v1296_v50, %v1295_v48 }
 0x1d9   :  { %1108 = vst [vmem:[#allocation2] sm:$0xff] %v1046_v51  ;;  %v1049_v54 = vadd.f32 %v1297_v53, %v1233_v52 }
 0x1db   :  { %1109 = vst [vmem:[#allocation2 + $0x8] sm:$0xff] %v1049_v54  ;;  %v1234_v55 = vpop.f32.mrb[36].mxu0  ;;  %v1298_v56 = vpop.f32.mrb[36].mxu1 }
 0x1dc   :  { %v1235_v57 = vpop.f32.mrb[37].mxu0  ;;  %v1299_v58 = vpop.f32.mrb[37].mxu1 }
 0x1dd   :  { %v1236_v59 = vadd.f32 %v1235_v57, %v1234_v55  ;;  %v1300_v60 = vadd.f32 %v1299_v58, %v1298_v56  ;;  %v1237_v61 = vpop.f32.mrb[38].mxu0  ;;  %v1301_v62 = vpop.f32.mrb[38].mxu1 }
 0x1de   :  { %v1238_v63 = vpop.f32.mrb[39].mxu0  ;;  %v1302_v0 = vpop.f32.mrb[39].mxu1 }
 0x1df   :  { %v1054_v1 = vadd.f32 %v1300_v60, %v1236_v59  ;;  %v1239_v3 = vadd.f32 %v1238_v63, %v1237_v61  ;;  %v1303_v4 = vadd.f32 %v1302_v0, %v1301_v62 }
 0x1e1   :  { %1110 = vst [vmem:[#allocation2 + $0x10] sm:$0xff] %v1054_v1  ;;  %v1057_v5 = vadd.f32 %v1303_v4, %v1239_v3 }
 0x1e3   :  { %1111 = vst [vmem:[#allocation2 + $0x18] sm:$0xff] %v1057_v5  ;;  %v1240_v6 = vpop.f32.mrb[40].mxu0  ;;  %v1304_v7 = vpop.f32.mrb[40].mxu1 }
 0x1e4   :  { %v1241_v8 = vpop.f32.mrb[41].mxu0  ;;  %v1305_v2 = vpop.f32.mrb[41].mxu1 }
 0x1e5   :  { %v1242_v9 = vadd.f32 %v1241_v8, %v1240_v6  ;;  %v1306_v10 = vadd.f32 %v1305_v2, %v1304_v7  ;;  %v1243_v11 = vpop.f32.mrb[42].mxu0  ;;  %v1307_v12 = vpop.f32.mrb[42].mxu1 }
 0x1e6   :  { %v1244_v13 = vpop.f32.mrb[43].mxu0  ;;  %v1308_v14 = vpop.f32.mrb[43].mxu1 }
 0x1e7   :  { %v1062_v15 = vadd.f32 %v1306_v10, %v1242_v9  ;;  %v1245_v16 = vadd.f32 %v1244_v13, %v1243_v11  ;;  %v1309_v17 = vadd.f32 %v1308_v14, %v1307_v12 }
 0x1e9   :  { %1112 = vst [vmem:[#allocation2 + $0x20] sm:$0xff] %v1062_v15  ;;  %v1065_v18 = vadd.f32 %v1309_v17, %v1245_v16 }
 0x1eb   :  { %1113 = vst [vmem:[#allocation2 + $0x28] sm:$0xff] %v1065_v18  ;;  %v1246_v19 = vpop.f32.mrb[44].mxu0  ;;  %v1310_v20 = vpop.f32.mrb[44].mxu1 }
 0x1ec   :  { %v1247_v21 = vpop.f32.mrb[45].mxu0  ;;  %v1311_v22 = vpop.f32.mrb[45].mxu1 }
 0x1ed   :  { %v1248_v23 = vadd.f32 %v1247_v21, %v1246_v19  ;;  %v1312_v24 = vadd.f32 %v1311_v22, %v1310_v20  ;;  %v1249_v25 = vpop.f32.mrb[46].mxu0  ;;  %v1313_v26 = vpop.f32.mrb[46].mxu1 }
 0x1ee   :  { %v1250_v27 = vpop.f32.mrb[47].mxu0  ;;  %v1314_v28 = vpop.f32.mrb[47].mxu1 }
 0x1ef   :  { %v1070_v29 = vadd.f32 %v1312_v24, %v1248_v23  ;;  %v1251_v30 = vadd.f32 %v1250_v27, %v1249_v25  ;;  %v1315_v31 = vadd.f32 %v1314_v28, %v1313_v26 }
 0x1f1   :  { %1114 = vst [vmem:[#allocation2 + $0x30] sm:$0xff] %v1070_v29  ;;  %v1073_v32 = vadd.f32 %v1315_v31, %v1251_v30 }
 0x1f3   :  { %1115 = vst [vmem:[#allocation2 + $0x38] sm:$0xff] %v1073_v32  ;;  %v1252_v33 = vpop.f32.mrb[48].mxu0  ;;  %v1316_v34 = vpop.f32.mrb[48].mxu1 }
 0x1f4   :  { %v1253_v35 = vpop.f32.mrb[49].mxu0  ;;  %v1317_v36 = vpop.f32.mrb[49].mxu1 }
 0x1f5   :  { %v1254_v37 = vadd.f32 %v1253_v35, %v1252_v33  ;;  %v1318_v38 = vadd.f32 %v1317_v36, %v1316_v34  ;;  %v1255_v39 = vpop.f32.mrb[50].mxu0  ;;  %v1319_v40 = vpop.f32.mrb[50].mxu1 }
 0x1f6   :  { %v1256_v41 = vpop.f32.mrb[51].mxu0  ;;  %v1320_v42 = vpop.f32.mrb[51].mxu1 }
 0x1f7   :  { %v1078_v43 = vadd.f32 %v1318_v38, %v1254_v37  ;;  %v1257_v44 = vadd.f32 %v1256_v41, %v1255_v39  ;;  %v1321_v45 = vadd.f32 %v1320_v42, %v1319_v40 }
 0x1f9   :  { %1116 = vst [vmem:[#allocation2 + $0x40] sm:$0xff] %v1078_v43  ;;  %v1081_v46 = vadd.f32 %v1321_v45, %v1257_v44 }
 0x1fb   :  { %1117 = vst [vmem:[#allocation2 + $0x48] sm:$0xff] %v1081_v46  ;;  %v1258_v47 = vpop.f32.mrb[52].mxu0  ;;  %v1322_v48 = vpop.f32.mrb[52].mxu1 }
 0x1fc   :  { %v1259_v49 = vpop.f32.mrb[53].mxu0  ;;  %v1323_v50 = vpop.f32.mrb[53].mxu1 }
 0x1fd   :  { %v1260_v51 = vadd.f32 %v1259_v49, %v1258_v47  ;;  %v1324_v52 = vadd.f32 %v1323_v50, %v1322_v48  ;;  %v1261_v53 = vpop.f32.mrb[54].mxu0  ;;  %v1325_v54 = vpop.f32.mrb[54].mxu1 }
 0x1fe   :  { %v1262_v55 = vpop.f32.mrb[55].mxu0  ;;  %v1326_v56 = vpop.f32.mrb[55].mxu1 }
 0x1ff   :  { %v1086_v57 = vadd.f32 %v1324_v52, %v1260_v51  ;;  %v1263_v58 = vadd.f32 %v1262_v55, %v1261_v53  ;;  %v1327_v59 = vadd.f32 %v1326_v56, %v1325_v54 }
 0x201   :  { %1118 = vst [vmem:[#allocation2 + $0x50] sm:$0xff] %v1086_v57  ;;  %v1089_v60 = vadd.f32 %v1327_v59, %v1263_v58 }
 0x203   :  { %1119 = vst [vmem:[#allocation2 + $0x58] sm:$0xff] %v1089_v60  ;;  %v1264_v61 = vpop.f32.mrb[56].mxu0  ;;  %v1328_v62 = vpop.f32.mrb[56].mxu1 }
 0x204   :  { %v1265_v63 = vpop.f32.mrb[57].mxu0  ;;  %v1329_v0 = vpop.f32.mrb[57].mxu1 }
 0x205   :  { %v1266_v1 = vadd.f32 %v1265_v63, %v1264_v61  ;;  %v1330_v3 = vadd.f32 %v1329_v0, %v1328_v62  ;;  %v1267_v4 = vpop.f32.mrb[58].mxu0  ;;  %v1331_v5 = vpop.f32.mrb[58].mxu1 }
 0x206   :  { %v1268_v6 = vpop.f32.mrb[59].mxu0  ;;  %v1332_v7 = vpop.f32.mrb[59].mxu1 }
 0x207   :  { %v1094_v8 = vadd.f32 %v1330_v3, %v1266_v1  ;;  %v1269_v2 = vadd.f32 %v1268_v6, %v1267_v4  ;;  %v1333_v9 = vadd.f32 %v1332_v7, %v1331_v5 }
 0x209   :  { %1120 = vst [vmem:[#allocation2 + $0x60] sm:$0xff] %v1094_v8  ;;  %v1097_v10 = vadd.f32 %v1333_v9, %v1269_v2 }
 0x20b   :  { %1121 = vst [vmem:[#allocation2 + $0x68] sm:$0xff] %v1097_v10  ;;  %v1270_v11 = vpop.f32.mrb[60].mxu0  ;;  %v1334_v12 = vpop.f32.mrb[60].mxu1 }
 0x20c   :  { %v1271_v13 = vpop.f32.mrb[61].mxu0  ;;  %v1335_v14 = vpop.f32.mrb[61].mxu1 }
 0x20d   :  { %v1272_v15 = vadd.f32 %v1271_v13, %v1270_v11  ;;  %v1336_v16 = vadd.f32 %v1335_v14, %v1334_v12  ;;  %v1273_v17 = vpop.f32.mrb[62].mxu0  ;;  %v1337_v18 = vpop.f32.mrb[62].mxu1 }
 0x20e   :  { %v1274_v19 = vpop.f32.mrb[63].mxu0  ;;  %v1338_v20 = vpop.f32.mrb[63].mxu1 }
 0x20f   :  { %v1102_v21 = vadd.f32 %v1336_v16, %v1272_v15  ;;  %v1275_v22 = vadd.f32 %v1274_v19, %v1273_v17  ;;  %v1339_v23 = vadd.f32 %v1338_v20, %v1337_v18 }
 0x211   :  { %1122 = vst [vmem:[#allocation2 + $0x70] sm:$0xff] %v1102_v21  ;;  %v1105_v24 = vadd.f32 %v1339_v23, %v1275_v22 }
 0x213   :  { %1123 = vst [vmem:[#allocation2 + $0x78] sm:$0xff] %v1105_v24 }
 0x214   :  { %1443 = shalt.err (!%p1440_p4)
}
 0x215   :  { %s1444_s21 = scalar_lea.hbm %s1727_s3, 2048 }
 0x216   :  { %p1445_p5 = scmp.ne.s32.totalorder %s1727_s3, %s1444_s21  ;;  %p1448_p6 = scmp.lt.u32.totalorder %s1444_s21, %s1727_s3 }
 0x218   :  { %p1450_p7 = pnand %p1448_p6, %p1445_p5 }
 0x21a   :  { %1453 = shalt.err (!%p1450_p7)
}
 0x21b   :  { %s1458_s26 = smov 128   ;;  %s1459_s27 = smov 8  }
 0x21c   :  { %1135 = dma.vmem_to_hbm [thread:$0]  %s1130_s2, 2048, %s1727_s3, [#allocation3], %s1458_s26, %s1458_s26, %s1459_s27  }
 0x21d   :  { %1454 = dma.done.wait [#allocation3], 2048  }
 0x21e   :  { %1455 = vsyncadd [#allocation3], 4294965248 }
 0x21f   :  { %1139 = vsyncpa [#allocation3], 1 }

</bundles_post_ra>
